<compile_context>
chip_gen: v5e
topology: v5e:2x2
jax: 0.10.0
libtpu: 0.0.40
codegen_flags: <defaults>
</compile_context>

<pallas_src>
import functools
import math

import jax
import jax.numpy as jnp
from jax.experimental import pallas as pl
from jax.experimental.pallas import tpu as pltpu


def _laplas_kernel(x_ref, w_ref, o_ref, xp_ref, im_ref, *, H, W, Wp, HW, C):
    # x_ref : (1, C, H*W)    unpadded image, rows flattened (lane-dense input DMA)
    # w_ref : (O, 9*C)       im2col weight, column order (dh*3 + dw)*C + c
    # o_ref : (1, O, HW)     lane-dense output slab, HW = H*Wp (Wp-stride rows)
    # xp_ref: (C, (H+3)*Wp)  zero-padded flattened image (VMEM scratch)
    # im_ref: (9*C, HW)      im2col matrix (VMEM scratch)

    # Build the zero halo in VMEM (replaces the wrapper-side jnp.pad HBM round-trip).
    # Zeroed every step: cheap at this size, and stays correct when the "parallel"
    # grid axis is split across TensorCores (no program_id==0 init dependence).
    xp_ref[...] = jnp.zeros_like(xp_ref)
    x_img = x_ref[0]                                    # (C, H*W), loaded once
    for h in range(H):                                  # interior fill, row stride Wp
        xp_ref[:, pl.ds((h + 1) * Wp + 1, W)] = x_img[:, h * W:(h + 1) * W]

    # Pack the 9 shifted tap slabs along the contraction axis -> (9C, HW).
    x_full = xp_ref[...]                                # (C, L), loaded once
    for dh in range(3):
        for dw in range(3):
            t = dh * 3 + dw
            start = dh * Wp + dw                        # static shift
            im_ref[pl.ds(t * C, C), :] = x_full[:, start:start + HW]

    # One fused MXU contraction (O, 9C) @ (9C, HW); store straight to the output.
    o_ref[0] = jnp.dot(w_ref[...], im_ref[...],
                       preferred_element_type=jnp.float32).astype(o_ref.dtype)


def laplas_gradient(x, weight):
    """x: (N, C, H, W) f32; weight: (O, C, 3, 3) Conv2d weight (stride 1, pad 1, no bias)."""
    N, C, H, W = x.shape
    O = weight.shape[0]

    # Padded row stride: smallest Wp >= W + 2 with (H * Wp) % 128 == 0, so the
    # output slab's lane extent is an exact multiple of 128 (unmasked stores).
    step = 128 // math.gcd(H, 128)
    Wp = ((W + 2 + step - 1) // step) * step
    HW = H * Wp
    L = (H + 3) * Wp          # +1 top pad row, +2 bottom pad rows keep all taps in-bounds

    # Free reshape of contiguous minor dims -> lane-dense input blocks.
    x_flat = x.reshape(N, C, H * W)
    # im2col weight: w2[o, (dh*3+dw)*C + c] = weight[o, c, dh, dw]  -> (O, 9C)
    w2 = jnp.transpose(weight, (0, 2, 3, 1)).reshape(O, 9 * C)

    kernel = functools.partial(_laplas_kernel, H=H, W=W, Wp=Wp, HW=HW, C=C)

    out_flat = pl.pallas_call(
        kernel,
        out_shape=jax.ShapeDtypeStruct((N, O, HW), x.dtype),
        grid_spec=pltpu.PrefetchScalarGridSpec(
            num_scalar_prefetch=0,
            grid=(N,),
            in_specs=[
                pl.BlockSpec((1, C, H * W), lambda n: (n, 0, 0)),
                pl.BlockSpec((O, 9 * C), lambda n: (0, 0)),
            ],
            out_specs=pl.BlockSpec((1, O, HW), lambda n: (n, 0, 0)),
            scratch_shapes=[
                pltpu.VMEM((C, L), jnp.float32),        # zero-padded image slab
                pltpu.VMEM((9 * C, HW), jnp.float32),   # im2col matrix
            ],
        ),
        compiler_params=pltpu.CompilerParams(
            dimension_semantics=("parallel",)),
    )(x_flat, w2)

    # Drop the Wp - W junk columns per row (single cheap XLA slice; a direct
    # (N, O, H, W) store would force masked W=16-wide vst's inside the kernel).
    return out_flat.reshape(N, O, H, Wp)[..., :W]


if __name__ == "__main__":
    indim, outdim = 4, 4
    N, H, W = 2, 16, 16

    # Exactly as LapLasGradient.__init__: every (out, in) pair holds kernel4.
    kernel4 = jnp.array([[1., 1., 1.], [1., -8., 1.], [1., 1., 1.]], jnp.float32)
    w = jnp.broadcast_to(kernel4, (outdim, indim, 3, 3)).astype(jnp.float32)

    key = jax.random.PRNGKey(0)
    x = jax.random.normal(key, (N, indim, H, W), dtype=jnp.float32)

    out = jax.jit(laplas_gradient)(x, w)
    out = jax.block_until_ready(out)

    # Cross-check against XLA's conv (same cross-correlation semantics as nn.Conv2d).
    ref = jax.lax.conv_general_dilated(
        x, w, window_strides=(1, 1), padding=((1, 1), (1, 1)),
        dimension_numbers=("NCHW", "OIHW", "NCHW"))
    assert out.shape == ref.shape, (out.shape, ref.shape)
    assert jnp.allclose(out, ref, atol=1e-3, rtol=1e-3), \
        float(jnp.max(jnp.abs(out - ref)))

    print("KERNEL_OK")
</pallas_src>

<mosaic_0001>
module attributes {stable_mosaic.version = 11 : i64} {
  func.func @_laplas_kernel(%arg0: i32, %arg1: memref<1x4x256xf32, #tpu.memory_space<vmem>>, %arg2: memref<4x36xf32, #tpu.memory_space<vmem>>, %arg3: memref<1x4x384xf32, #tpu.memory_space<vmem>>, %arg4: memref<4x456xf32, #tpu.memory_space<vmem>>, %arg5: memref<36x384xf32, #tpu.memory_space<vmem>>) attributes {dimension_semantics = [#tpu.dimension_semantics<parallel>], iteration_bounds = array<i64: 2>, scalar_prefetch = 0 : i64, scratch_operands = 2 : i64, tpu.core_type = #tpu.core_type<tc>, window_params = [{transform_indices = @transform_0, window_bounds = array<i64: 1, 4, 256>}, {pipeline_mode = #tpu.pipeline_mode<synchronous>, transform_indices = @transform_1, window_bounds = array<i64: 4, 36>}, {transform_indices = @transform_2, window_bounds = array<i64: 1, 4, 384>}]} {
    %cst = arith.constant 0.000000e+00 : f32
    %0 = vector.broadcast %cst : f32 to vector<4x456xf32>
    %c0 = arith.constant 0 : index
    %c0_0 = arith.constant 0 : index
    %1 = vector.load %arg4[%c0, %c0_0] : memref<4x456xf32, #tpu.memory_space<vmem>>, vector<4x456xf32>
    tpu.vector_store %arg4[%c0, %c0_0], %0 {strides = array<i32>} : memref<4x456xf32, #tpu.memory_space<vmem>>, vector<4x456xf32>,
    %c0_1 = arith.constant 0 : index
    %c0_2 = arith.constant 0 : index
    %c0_3 = arith.constant 0 : index
    %2 = vector.load %arg1[%c0_1, %c0_2, %c0_3] : memref<1x4x256xf32, #tpu.memory_space<vmem>>, vector<1x4x256xf32>
    %3 = vector.shape_cast %2 : vector<1x4x256xf32> to vector<4x256xf32>
    %4 = vector.extract_strided_slice %3 {offsets = [0, 0], sizes = [4, 16], strides = [1, 1]} : vector<4x256xf32> to vector<4x16xf32>
    %c0_4 = arith.constant 0 : index
    %c25 = arith.constant 25 : index
    %5 = vector.load %arg4[%c0_4, %c25] : memref<4x456xf32, #tpu.memory_space<vmem>>, vector<4x16xf32>
    tpu.vector_store %arg4[%c0_4, %c25], %4 {strides = array<i32>} : memref<4x456xf32, #tpu.memory_space<vmem>>, vector<4x16xf32>,
    %6 = vector.extract_strided_slice %3 {offsets = [0, 16], sizes = [4, 16], strides = [1, 1]} : vector<4x256xf32> to vector<4x16xf32>
    %c0_5 = arith.constant 0 : index
    %c49 = arith.constant 49 : index
    %7 = vector.load %arg4[%c0_5, %c49] : memref<4x456xf32, #tpu.memory_space<vmem>>, vector<4x16xf32>
    tpu.vector_store %arg4[%c0_5, %c49], %6 {strides = array<i32>} : memref<4x456xf32, #tpu.memory_space<vmem>>, vector<4x16xf32>,
    %8 = vector.extract_strided_slice %3 {offsets = [0, 32], sizes = [4, 16], strides = [1, 1]} : vector<4x256xf32> to vector<4x16xf32>
    %c0_6 = arith.constant 0 : index
    %c73 = arith.constant 73 : index
    %9 = vector.load %arg4[%c0_6, %c73] : memref<4x456xf32, #tpu.memory_space<vmem>>, vector<4x16xf32>
    tpu.vector_store %arg4[%c0_6, %c73], %8 {strides = array<i32>} : memref<4x456xf32, #tpu.memory_space<vmem>>, vector<4x16xf32>,
    %10 = vector.extract_strided_slice %3 {offsets = [0, 48], sizes = [4, 16], strides = [1, 1]} : vector<4x256xf32> to vector<4x16xf32>
    %c0_7 = arith.constant 0 : index
    %c97 = arith.constant 97 : index
    %11 = vector.load %arg4[%c0_7, %c97] : memref<4x456xf32, #tpu.memory_space<vmem>>, vector<4x16xf32>
    tpu.vector_store %arg4[%c0_7, %c97], %10 {strides = array<i32>} : memref<4x456xf32, #tpu.memory_space<vmem>>, vector<4x16xf32>,
    %12 = vector.extract_strided_slice %3 {offsets = [0, 64], sizes = [4, 16], strides = [1, 1]} : vector<4x256xf32> to vector<4x16xf32>
    %c0_8 = arith.constant 0 : index
    %c121 = arith.constant 121 : index
    %13 = vector.load %arg4[%c0_8, %c121] : memref<4x456xf32, #tpu.memory_space<vmem>>, vector<4x16xf32>
    tpu.vector_store %arg4[%c0_8, %c121], %12 {strides = array<i32>} : memref<4x456xf32, #tpu.memory_space<vmem>>, vector<4x16xf32>,
    %14 = vector.extract_strided_slice %3 {offsets = [0, 80], sizes = [4, 16], strides = [1, 1]} : vector<4x256xf32> to vector<4x16xf32>
    %c0_9 = arith.constant 0 : index
    %c145 = arith.constant 145 : index
    %15 = vector.load %arg4[%c0_9, %c145] : memref<4x456xf32, #tpu.memory_space<vmem>>, vector<4x16xf32>
    tpu.vector_store %arg4[%c0_9, %c145], %14 {strides = array<i32>} : memref<4x456xf32, #tpu.memory_space<vmem>>, vector<4x16xf32>,
    %16 = vector.extract_strided_slice %3 {offsets = [0, 96], sizes = [4, 16], strides = [1, 1]} : vector<4x256xf32> to vector<4x16xf32>
    %c0_10 = arith.constant 0 : index
    %c169 = arith.constant 169 : index
    %17 = vector.load %arg4[%c0_10, %c169] : memref<4x456xf32, #tpu.memory_space<vmem>>, vector<4x16xf32>
    tpu.vector_store %arg4[%c0_10, %c169], %16 {strides = array<i32>} : memref<4x456xf32, #tpu.memory_space<vmem>>, vector<4x16xf32>,
    %18 = vector.extract_strided_slice %3 {offsets = [0, 112], sizes = [4, 16], strides = [1, 1]} : vector<4x256xf32> to vector<4x16xf32>
    %c0_11 = arith.constant 0 : index
    %c193 = arith.constant 193 : index
    %19 = vector.load %arg4[%c0_11, %c193] : memref<4x456xf32, #tpu.memory_space<vmem>>, vector<4x16xf32>
    tpu.vector_store %arg4[%c0_11, %c193], %18 {strides = array<i32>} : memref<4x456xf32, #tpu.memory_space<vmem>>, vector<4x16xf32>,
    %20 = vector.extract_strided_slice %3 {offsets = [0, 128], sizes = [4, 16], strides = [1, 1]} : vector<4x256xf32> to vector<4x16xf32>
    %c0_12 = arith.constant 0 : index
    %c217 = arith.constant 217 : index
    %21 = vector.load %arg4[%c0_12, %c217] : memref<4x456xf32, #tpu.memory_space<vmem>>, vector<4x16xf32>
    tpu.vector_store %arg4[%c0_12, %c217], %20 {strides = array<i32>} : memref<4x456xf32, #tpu.memory_space<vmem>>, vector<4x16xf32>,
    %22 = vector.extract_strided_slice %3 {offsets = [0, 144], sizes = [4, 16], strides = [1, 1]} : vector<4x256xf32> to vector<4x16xf32>
    %c0_13 = arith.constant 0 : index
    %c241 = arith.constant 241 : index
    %23 = vector.load %arg4[%c0_13, %c241] : memref<4x456xf32, #tpu.memory_space<vmem>>, vector<4x16xf32>
    tpu.vector_store %arg4[%c0_13, %c241], %22 {strides = array<i32>} : memref<4x456xf32, #tpu.memory_space<vmem>>, vector<4x16xf32>,
    %24 = vector.extract_strided_slice %3 {offsets = [0, 160], sizes = [4, 16], strides = [1, 1]} : vector<4x256xf32> to vector<4x16xf32>
    %c0_14 = arith.constant 0 : index
    %c265 = arith.constant 265 : index
    %25 = vector.load %arg4[%c0_14, %c265] : memref<4x456xf32, #tpu.memory_space<vmem>>, vector<4x16xf32>
    tpu.vector_store %arg4[%c0_14, %c265], %24 {strides = array<i32>} : memref<4x456xf32, #tpu.memory_space<vmem>>, vector<4x16xf32>,
    %26 = vector.extract_strided_slice %3 {offsets = [0, 176], sizes = [4, 16], strides = [1, 1]} : vector<4x256xf32> to vector<4x16xf32>
    %c0_15 = arith.constant 0 : index
    %c289 = arith.constant 289 : index
    %27 = vector.load %arg4[%c0_15, %c289] : memref<4x456xf32, #tpu.memory_space<vmem>>, vector<4x16xf32>
    tpu.vector_store %arg4[%c0_15, %c289], %26 {strides = array<i32>} : memref<4x456xf32, #tpu.memory_space<vmem>>, vector<4x16xf32>,
    %28 = vector.extract_strided_slice %3 {offsets = [0, 192], sizes = [4, 16], strides = [1, 1]} : vector<4x256xf32> to vector<4x16xf32>
    %c0_16 = arith.constant 0 : index
    %c313 = arith.constant 313 : index
    %29 = vector.load %arg4[%c0_16, %c313] : memref<4x456xf32, #tpu.memory_space<vmem>>, vector<4x16xf32>
    tpu.vector_store %arg4[%c0_16, %c313], %28 {strides = array<i32>} : memref<4x456xf32, #tpu.memory_space<vmem>>, vector<4x16xf32>,
    %30 = vector.extract_strided_slice %3 {offsets = [0, 208], sizes = [4, 16], strides = [1, 1]} : vector<4x256xf32> to vector<4x16xf32>
    %c0_17 = arith.constant 0 : index
    %c337 = arith.constant 337 : index
    %31 = vector.load %arg4[%c0_17, %c337] : memref<4x456xf32, #tpu.memory_space<vmem>>, vector<4x16xf32>
    tpu.vector_store %arg4[%c0_17, %c337], %30 {strides = array<i32>} : memref<4x456xf32, #tpu.memory_space<vmem>>, vector<4x16xf32>,
    %32 = vector.extract_strided_slice %3 {offsets = [0, 224], sizes = [4, 16], strides = [1, 1]} : vector<4x256xf32> to vector<4x16xf32>
    %c0_18 = arith.constant 0 : index
    %c361 = arith.constant 361 : index
    %33 = vector.load %arg4[%c0_18, %c361] : memref<4x456xf32, #tpu.memory_space<vmem>>, vector<4x16xf32>
    tpu.vector_store %arg4[%c0_18, %c361], %32 {strides = array<i32>} : memref<4x456xf32, #tpu.memory_space<vmem>>, vector<4x16xf32>,
    %34 = vector.extract_strided_slice %3 {offsets = [0, 240], sizes = [4, 16], strides = [1, 1]} : vector<4x256xf32> to vector<4x16xf32>
    %c0_19 = arith.constant 0 : index
    %c385 = arith.constant 385 : index
    %35 = vector.load %arg4[%c0_19, %c385] : memref<4x456xf32, #tpu.memory_space<vmem>>, vector<4x16xf32>
    tpu.vector_store %arg4[%c0_19, %c385], %34 {strides = array<i32>} : memref<4x456xf32, #tpu.memory_space<vmem>>, vector<4x16xf32>,
    %c0_20 = arith.constant 0 : index
    %c0_21 = arith.constant 0 : index
    %36 = vector.load %arg4[%c0_20, %c0_21] : memref<4x456xf32, #tpu.memory_space<vmem>>, vector<4x456xf32>
    %37 = vector.extract_strided_slice %36 {offsets = [0, 0], sizes = [4, 384], strides = [1, 1]} : vector<4x456xf32> to vector<4x384xf32>
    %c0_22 = arith.constant 0 : index
    %c0_23 = arith.constant 0 : index
    %38 = vector.load %arg5[%c0_22, %c0_23] : memref<36x384xf32, #tpu.memory_space<vmem>>, vector<4x384xf32>
    tpu.vector_store %arg5[%c0_22, %c0_23], %37 {strides = array<i32>} : memref<36x384xf32, #tpu.memory_space<vmem>>, vector<4x384xf32>,
    %39 = vector.extract_strided_slice %36 {offsets = [0, 1], sizes = [4, 384], strides = [1, 1]} : vector<4x456xf32> to vector<4x384xf32>
    %c4 = arith.constant 4 : index
    %c0_24 = arith.constant 0 : index
    %40 = vector.load %arg5[%c4, %c0_24] : memref<36x384xf32, #tpu.memory_space<vmem>>, vector<4x384xf32>
    tpu.vector_store %arg5[%c4, %c0_24], %39 {strides = array<i32>} : memref<36x384xf32, #tpu.memory_space<vmem>>, vector<4x384xf32>,
    %41 = vector.extract_strided_slice %36 {offsets = [0, 2], sizes = [4, 384], strides = [1, 1]} : vector<4x456xf32> to vector<4x384xf32>
    %c8 = arith.constant 8 : index
    %c0_25 = arith.constant 0 : index
    %42 = vector.load %arg5[%c8, %c0_25] : memref<36x384xf32, #tpu.memory_space<vmem>>, vector<4x384xf32>
    tpu.vector_store %arg5[%c8, %c0_25], %41 {strides = array<i32>} : memref<36x384xf32, #tpu.memory_space<vmem>>, vector<4x384xf32>,
    %43 = vector.extract_strided_slice %36 {offsets = [0, 24], sizes = [4, 384], strides = [1, 1]} : vector<4x456xf32> to vector<4x384xf32>
    %c12 = arith.constant 12 : index
    %c0_26 = arith.constant 0 : index
    %44 = vector.load %arg5[%c12, %c0_26] : memref<36x384xf32, #tpu.memory_space<vmem>>, vector<4x384xf32>
    tpu.vector_store %arg5[%c12, %c0_26], %43 {strides = array<i32>} : memref<36x384xf32, #tpu.memory_space<vmem>>, vector<4x384xf32>,
    %45 = vector.extract_strided_slice %36 {offsets = [0, 25], sizes = [4, 384], strides = [1, 1]} : vector<4x456xf32> to vector<4x384xf32>
    %c16 = arith.constant 16 : index
    %c0_27 = arith.constant 0 : index
    %46 = vector.load %arg5[%c16, %c0_27] : memref<36x384xf32, #tpu.memory_space<vmem>>, vector<4x384xf32>
    tpu.vector_store %arg5[%c16, %c0_27], %45 {strides = array<i32>} : memref<36x384xf32, #tpu.memory_space<vmem>>, vector<4x384xf32>,
    %47 = vector.extract_strided_slice %36 {offsets = [0, 26], sizes = [4, 384], strides = [1, 1]} : vector<4x456xf32> to vector<4x384xf32>
    %c20 = arith.constant 20 : index
    %c0_28 = arith.constant 0 : index
    %48 = vector.load %arg5[%c20, %c0_28] : memref<36x384xf32, #tpu.memory_space<vmem>>, vector<4x384xf32>
    tpu.vector_store %arg5[%c20, %c0_28], %47 {strides = array<i32>} : memref<36x384xf32, #tpu.memory_space<vmem>>, vector<4x384xf32>,
    %49 = vector.extract_strided_slice %36 {offsets = [0, 48], sizes = [4, 384], strides = [1, 1]} : vector<4x456xf32> to vector<4x384xf32>
    %c24 = arith.constant 24 : index
    %c0_29 = arith.constant 0 : index
    %50 = vector.load %arg5[%c24, %c0_29] : memref<36x384xf32, #tpu.memory_space<vmem>>, vector<4x384xf32>
    tpu.vector_store %arg5[%c24, %c0_29], %49 {strides = array<i32>} : memref<36x384xf32, #tpu.memory_space<vmem>>, vector<4x384xf32>,
    %51 = vector.extract_strided_slice %36 {offsets = [0, 49], sizes = [4, 384], strides = [1, 1]} : vector<4x456xf32> to vector<4x384xf32>
    %c28 = arith.constant 28 : index
    %c0_30 = arith.constant 0 : index
    %52 = vector.load %arg5[%c28, %c0_30] : memref<36x384xf32, #tpu.memory_space<vmem>>, vector<4x384xf32>
    tpu.vector_store %arg5[%c28, %c0_30], %51 {strides = array<i32>} : memref<36x384xf32, #tpu.memory_space<vmem>>, vector<4x384xf32>,
    %53 = vector.extract_strided_slice %36 {offsets = [0, 50], sizes = [4, 384], strides = [1, 1]} : vector<4x456xf32> to vector<4x384xf32>
    %c32 = arith.constant 32 : index
    %c0_31 = arith.constant 0 : index
    %54 = vector.load %arg5[%c32, %c0_31] : memref<36x384xf32, #tpu.memory_space<vmem>>, vector<4x384xf32>
    tpu.vector_store %arg5[%c32, %c0_31], %53 {strides = array<i32>} : memref<36x384xf32, #tpu.memory_space<vmem>>, vector<4x384xf32>,
    %c0_32 = arith.constant 0 : index
    %c0_33 = arith.constant 0 : index
    %55 = vector.load %arg2[%c0_32, %c0_33] : memref<4x36xf32, #tpu.memory_space<vmem>>, vector<4x36xf32>
    %c0_34 = arith.constant 0 : index
    %c0_35 = arith.constant 0 : index
    %56 = vector.load %arg5[%c0_34, %c0_35] : memref<36x384xf32, #tpu.memory_space<vmem>>, vector<36x384xf32>
    %cst_36 = arith.constant dense<0.000000e+00> : vector<4x384xf32>
    %57 = tpu.matmul %55, %56, %cst_36 {dimension_numbers = #tpu.dot_dimension_numbers<[1], [0], [0], [1], [0, 0, 1, 1], [], []>} : vector<4x36xf32>, vector<36x384xf32>, vector<4x384xf32> -> vector<4x384xf32>
    %c0_37 = arith.constant 0 : index
    %c0_38 = arith.constant 0 : index
    %c0_39 = arith.constant 0 : index
    %58 = vector.load %arg3[%c0_37, %c0_38, %c0_39] : memref<1x4x384xf32, #tpu.memory_space<vmem>>, vector<1x4x384xf32>
    %59 = vector.shape_cast %58 : vector<1x4x384xf32> to vector<4x384xf32>
    %60 = vector.shape_cast %57 : vector<4x384xf32> to vector<1x4x384xf32>
    tpu.vector_store %arg3[%c0_37, %c0_38, %c0_39], %60 {strides = array<i32>} : memref<1x4x384xf32, #tpu.memory_space<vmem>>, vector<1x4x384xf32>,
    return
  }
  func.func @transform_0(%arg0: i32) -> (i32, i32, i32) {
    %c0_i32 = arith.constant 0 : i32
    %c0_i32_0 = arith.constant 0 : i32
    %c0_i32_1 = arith.constant 0 : i32
    return %arg0, %c0_i32, %c0_i32_0 : i32, i32, i32
  }
  func.func @transform_1(%arg0: i32) -> (i32, i32) {
    %c0_i32 = arith.constant 0 : i32
    %c0_i32_0 = arith.constant 0 : i32
    %c0_i32_1 = arith.constant 0 : i32
    return %c0_i32, %c0_i32_0 : i32, i32
  }
  func.func @transform_2(%arg0: i32) -> (i32, i32, i32) {
    %c0_i32 = arith.constant 0 : i32
    %c0_i32_0 = arith.constant 0 : i32
    %c0_i32_1 = arith.constant 0 : i32
    return %arg0, %c0_i32, %c0_i32_0 : i32, i32, i32
  }
}

</mosaic_0001>

<bundles_post_ra>
// kernel: laplas_gradient.1
= control target key start
LH: loop header
LB: loop body
LE: loop exit
PB: predicated region body
PF: predicated region fallthrough
CT: control target
= control target key end

     0   :  { %s724_s9 = smov 0   ;;  %s837_s0 = inlined_call_operand.vmem [shape: f32[2,4,256], index: 0, kind: input, shape index: {}]   ;;  %s838_s1 = inlined_call_operand.vmem [shape: f32[4,36], index: 1, kind: input, shape index: {}]   ;;  %s839_s2 = inlined_call_operand.vmem [shape: f32[2,4,384], index: 2, kind: output, shape index: {}]  }
   0x1 LB: > { %s625_s10 = sadd.s32 4294967295, %s682_s9   ;;  %p629_p0 = scmp.ge.s32.totalorder %s682_s9, 1  ;;  %s682_s9 = sphi %s724_s9, %s12_s9  }
   0x2   : > { %p112_p1 = scmp.lt.s32.totalorder %s682_s9, 3 }
   0x4   : > { %p113_p2 = pnand %p629_p0, %p112_p1 }
   0x5   : > { %p134_p3 = scmp.lt.s32.totalorder (!%p113_p2), %s625_s10, 1  ;;  %s684_s15 = smov (!%p113_p2), 25  }
   0x6   : > { %116 = sbr.rel (%p113_p2) target bundleno = 539 (0x21b), region = 28  ;;  %s685_s16 = smov (!%p113_p2), 57  }
   0x7   : > { %s686_s17 = smov (!%p113_p2), 49   ;;  %s687_s18 = smov (!%p113_p2), 33  }
   0x8   : > { %s688_s19 = smov (!%p113_p2), 41   ;;  %s689_s20 = smov (!%p113_p2), 65  }
   0x9   : > { %s691_s21 = smov (!%p113_p2), 89   ;;  %s692_s22 = smov (!%p113_p2), 73  }
   0xa   : > { %s693_s23 = smov (!%p113_p2), 97   ;;  %s694_s24 = smov (!%p113_p2), 81  }
   0xb   : > { %s841_s10 = smov (!%p134_p3, %s625_s10), 1  ;;  %vm145_vm0 = vcmask 1043456   ;;  %vm146_vm1 = vcmask 588804   ;;  %v690_v1 = vmov 0.0   ;;  %s695_s25 = smov 105   ;;  %vm154_vm3 = vcmask 330952  }
   0xc   : > { %s641_s11 = sshll.u32 %s841_s10, 3  ;;  %144 = vst [vmem:[#allocation2] sm:$0xff] %v690_v1  ;;  %vm147_vm2 = vmor %vm146_vm1, %vm145_vm0  ;;  %s696_s26 = smov 113   ;;  %vm159_vm4 = vcmask 527752   ;;  %vm177_vm5 = vcmask 1044424   ;;  %vm178_vm6 = vcmask 72708  }
   0xd   : > { %s138_s14 = scalar_lea.vmem %s837_s0, %s641_s11  ;;  %148 = vst.msk [vmem:[#allocation2 + $0x8] sm:$0xff] %vm147_vm2, %v690_v1  ;;  %s697_s27 = smov 121   ;;  %vm164_vm7 = vcmask 724552   ;;  %vm174_vm8 = vcmask 465920   ;;  %vm169_vm9 = vcmask 921352   ;;  %vm179_vm10 = vmor %vm178_vm6, %vm177_vm5  ;;  %vm184_vm11 = vcmask 265352  }
   0xe   : > { %v149_v0 = vld [vmem:[%s138_s14] sm:$0xff]  ;;  %s698_s28 = smov 1   ;;  %s699_s29 = smov 9   ;;  %vm189_vm12 = vcmask 462152   ;;  %vm210_vm13 = vcmask 1044360   ;;  %vm211_vm14 = vcmask 7172  }
   0xf   : > { %151 = vrot.lane.b32.xlu0 %v149_v0, %s684_s15  ;;  %171 = vrot.lane.b32.xlu1 %v149_v0, %s685_s16  ;;  %s700_s30 = smov 17   ;;  %vm199_vm15 = vcmask 728064   ;;  %vm194_vm1 = vcmask 658952   ;;  %vm207_vm2 = vcmask 793600   ;;  %vm218_vm5 = vcmask 199752   ;;  %s701_s3 = smov 126  }
  0x10   : > { %166 = vrot.lane.b32.xlu2 %v149_v0, %s686_s17  ;;  %vm224_vm6 = vcmask 396552   ;;  %s702_s4 = smov 127   ;;  %s703_s5 = smov 104  }
  0x11   : > { %s704_s6 = smov 103   ;;  %s705_s7 = smov 102  }
  0x12   : > { %s706_s8 = smov 80   ;;  %s707_s11 = smov 79  }
  0x13   : > { %s708_s12 = smov 78   ;;  %s642_s15 = smul.u32 12, %s841_s10 }
  0x17   : > { %156 = vrot.lane.b32.xlu0 %v149_v0, %s687_s18  ;;  %161 = vrot.lane.b32.xlu1 %v149_v0, %s688_s19  ;;  %s143_s18 = scalar_lea.vmem %s839_s2, %s642_s15 }
  0x18   : > { %181 = vrot.lane.b32.xlu2 %v149_v0, %s689_s20 }
  0x1f   : > { %196 = vrot.lane.b32.xlu0 %v149_v0, %s691_s21  ;;  %186 = vrot.lane.b32.xlu1 %v149_v0, %s692_s22 }
  0x20   : > { %204 = vrot.lane.b32.xlu2 %v149_v0, %s693_s23 }
  0x27   : > { %191 = vrot.lane.b32.xlu0 %v149_v0, %s694_s24  ;;  %214 = vrot.lane.b32.xlu1 %v149_v0, %s695_s25 }
  0x28   : > { %220 = vrot.lane.b32.xlu2 %v149_v0, %s696_s26 }
  0x2f   : > { %226 = vrot.lane.b32.xlu0 %v149_v0, %s697_s27  ;;  %232 = vrot.lane.b32.xlu1 %v149_v0, %s698_s28 }
  0x30   : > { %240 = vrot.lane.b32.xlu2 %v149_v0, %s699_s29 }
  0x37   : > { %248 = vrot.lane.b32.xlu0 %v149_v0, %s700_s30 }
  0x6a   : > { %v167_v2 = vpop.permute.xlu2 %166 }
  0x72   : > { %v182_v3 = vpop.permute.xlu2 %181 }
  0x7a   : > { %v205_v7 = vpop.permute.xlu2 %204 }
  0x7b   : > { %v206_v15 = vrot.slane %v205_v7, 4 }
  0x7d   : > { %v208_v21 = vsel %vm207_vm2, %v205_v7, %v206_v15  ;;  %vm388_vm2 = vcmask 834560  }
  0x81   : > { %v152_v4 = vpop.permute.xlu0 %151  ;;  %v172_v5 = vpop.permute.xlu1 %171 }
  0x82   : > { %155 = vst.msk [vmem:[#allocation2] sm:$0xf] %vm154_vm3, %v152_v4  ;;  %v173_v6 = vrot.slane %v172_v5, 4  ;;  %v221_v13 = vpop.permute.xlu2 %220  ;;  %vm202_vm3 = vcmask 855752  }
  0x83   : > { %v222_v20 = vrot.slane %v221_v13, 4 }
  0x84   : > { %v175_v10 = vsel %vm174_vm8, %v173_v6, %v172_v5  ;;  %vm243_vm8 = vcmask 72704  }
  0x89   : > { %v157_v8 = vpop.permute.xlu0 %156  ;;  %v162_v9 = vpop.permute.xlu1 %161 }
  0x8a   : > { %160 = vst.msk [vmem:[#allocation2] sm:$0xf] %vm159_vm4, %v157_v8  ;;  %vm212_vm4 = vmor %vm211_vm14, %vm210_vm13  ;;  %v241_v22 = vpop.permute.xlu2 %240  ;;  %vm337_vm13 = vcmask 850944   ;;  %vm286_vm14 = vcmask 1039360  }
  0x8b   : > { %165 = vst.msk [vmem:[#allocation2] sm:$0xf] %vm164_vm7, %v162_v9  ;;  %v242_v23 = vrot.slane %v241_v22, 4  ;;  %vm235_vm7 = vcmask 7168  }
  0x8c   : > { %170 = vst.msk [vmem:[#allocation2] sm:$0xf] %vm169_vm9, %v167_v2  ;;  %vm230_vm9 = vcmask 593352  }
  0x8d   : > { %180 = vst.msk [vmem:[#allocation2] sm:$0xff] %vm179_vm10, %v175_v10  ;;  %vm238_vm10 = vcmask 790152   ;;  %v244_v30 = vsel %vm243_vm8, %v241_v22, %v242_v23 }
  0x8e   : > { %185 = vst.msk [vmem:[#allocation2 + $0x4] sm:$0xf] %vm184_vm11, %v182_v3  ;;  %vm246_vm11 = vcmask 986952  }
  0x91   : > { %v197_v11 = vpop.permute.xlu0 %196  ;;  %v187_v12 = vpop.permute.xlu1 %186 }
  0x92   : > { %190 = vst.msk [vmem:[#allocation2 + $0x4] sm:$0xf] %vm189_vm12, %v187_v12  ;;  %v198_v14 = vrot.slane %v197_v11, 4  ;;  %vm252_vm12 = vcmask 134152  }
  0x94   : > { %v200_v18 = vsel %vm199_vm15, %v197_v11, %v198_v14  ;;  %vm311_vm15 = vcmask 1031168  }
  0x99   : > { %v192_v16 = vpop.permute.xlu0 %191  ;;  %v215_v17 = vpop.permute.xlu1 %214 }
  0x9a   : > { %195 = vst.msk [vmem:[#allocation2 + $0x4] sm:$0xf] %vm194_vm1, %v192_v16  ;;  %v216_v19 = vrot.slane %v215_v17, 4  ;;  %vm362_vm1 = vcmask 842752  }
  0x9b   : > { %203 = vst.msk [vmem:[#allocation2 + $0x4] sm:$0xf] %vm202_vm3, %v200_v18  ;;  %vm413_vm3 = vcmask 654336  }
  0x9c   : > { %213 = vst.msk [vmem:[#allocation2 + $0x4] sm:$0xff] %vm212_vm4, %v208_v21  ;;  %vm439_vm4 = vcmask 646144  }
  0x9d   : > { %219 = vst.msk [vmem:[#allocation2 + $0x8] sm:$0xf] %vm218_vm5, %v216_v19  ;;  %vm464_vm5 = vcmask 637952  }
  0x9e   : > { %225 = vst.msk [vmem:[#allocation2 + $0x8] sm:$0xf] %vm224_vm6, %v222_v20  ;;  %vm490_vm6 = vcmask 293888  }
  0xa1   : > { %v227_v24 = vpop.permute.xlu0 %226  ;;  %v233_v25 = vpop.permute.xlu1 %232 }
  0xa2   : > { %v228_v26 = vrot.slane %v227_v24, 4  ;;  %v234_v27 = vrot.slane %v233_v25, 4 }
  0xa3   : > { %v739_v28 = vld [vmem:[#allocation2] sm:$0xff] }
  0xa4   : > { %258 = vst [vmem:[#allocation1] ss:$2 sm:$0xff] %v739_v28  ;;  %v236_v29 = vsel %vm235_vm7, %v233_v25, %v234_v27 }
  0xa5   : > { %231 = vst.msk [vmem:[#allocation2 + $0x8] sm:$0xf] %vm230_vm9, %v228_v26 }
  0xa6   : > { %239 = vst.msk [vmem:[#allocation2 + $0x8] sm:$0xf] %vm238_vm10, %v236_v29 }
  0xa7   : > { %247 = vst.msk [vmem:[#allocation2 + $0x8] sm:$0xf] %vm246_vm11, %v244_v30 }
  0xa9   : > { %v249_v31 = vpop.permute.xlu0 %248 }
  0xaa   : > { %v250_v32 = vrot.slane %v249_v31, 4 }
  0xab   : > { %v261_v33 = vld.sshfl [vmem:[#allocation1] sm:$0xff pattern:$0x75316420]  ;;  %v262_v34 = vld.sshfl [vmem:[#allocation1 + $0x8] sm:$0xff pattern:$0x75316420] }
  0xac   : > { %253 = vst.msk [vmem:[#allocation2 + $0xc] sm:$0xf] %vm252_vm12, %v250_v32 }
  0xad   : > { %271 = vst [vmem:[#allocation1 + $0x1] ss:$2 sm:$0xff] %v739_v28 }
  0xae   : > { %267 = vst [vmem:[#allocation3 + $0x30] sm:$0xf] %v261_v33 }
  0xaf   : > { %268 = vst [vmem:[#allocation3] sm:$0xf] %v262_v34 }
  0xb3   : > { %v743_v35 = vld [vmem:[#allocation2 + $0x8] sm:$0xff] }
  0xb4   : > { %260 = vst [vmem:[#allocation1 + $0x10] ss:$2 sm:$0xff] %v743_v35  ;;  %v746_v36 = vld.sshfl [vmem:[#allocation1] sm:$0xff pattern:$0x75316420] }
  0xb5   : > { %v748_v37 = vld.sshfl [vmem:[#allocation1 + $0x8] sm:$0xff pattern:$0x75316420] }
  0xb6   : > { %296 = vst [vmem:[#allocation1] ss:$2 sm:$0xff] %v739_v28 }
  0xbb   : > { %v263_v38 = vld.sshfl [vmem:[#allocation1 + $0x10] sm:$0xff pattern:$0x75316420] }
  0xbc   : > { %273 = vst [vmem:[#allocation1 + $0x11] ss:$2 sm:$0xff] %v743_v35 }
  0xbd   : > { %v300_v39 = vld.sshfl [vmem:[#allocation1 + $0x8] sm:$0xff pattern:$0x75316420]  ;;  %v752_v40 = vld.sshfl [vmem:[#allocation1] sm:$0xff pattern:$0x75316420] }
  0xbe   : > { %305 = vrot.lane.b32.xlu1 %v300_v39, %s701_s3  ;;  %322 = vst [vmem:[#allocation1 + $0x1] ss:$2 sm:$0xff] %v739_v28 }
  0xbf   : > { %269 = vst [vmem:[#allocation3 + $0x58] sm:$0xf] %v263_v38 }
  0xc3   : > { %v277_v41 = vld.sshfl [vmem:[#allocation1 + $0x18] sm:$0xff pattern:$0x75316420]  ;;  %v276_v42 = vld.sshfl [vmem:[#allocation1 + $0x10] sm:$0xff pattern:$0x75316420] }
  0xc4   : > { %284 = vrot.lane.b32.xlu0 %v277_v41, %s702_s4  ;;  %282 = vrot.lane.b32.xlu2 %v276_v42, %s702_s4  ;;  %298 = vst [vmem:[#allocation1 + $0x10] ss:$2 sm:$0xff] %v743_v35 }
  0xc5   : > { %v759_v43 = vld.sshfl [vmem:[#allocation1] sm:$0xff pattern:$0x75316420]  ;;  %v326_v44 = vld.sshfl [vmem:[#allocation1 + $0x8] sm:$0xff pattern:$0x75316420] }
  0xc6   : > { %347 = vst [vmem:[#allocation1] ss:$2 sm:$0xff] %v739_v28 }
  0xcb   : > { %v302_v45 = vld.sshfl [vmem:[#allocation1 + $0x18] sm:$0xff pattern:$0x75316420]  ;;  %v301_v46 = vld.sshfl [vmem:[#allocation1 + $0x10] sm:$0xff pattern:$0x75316420] }
  0xcc   : > { %331 = vrot.lane.b32.xlu2 %v326_v44, %s703_s5  ;;  %309 = vrot.lane.b32.xlu1 %v302_v45, %s701_s3  ;;  %324 = vst [vmem:[#allocation1 + $0x11] ss:$2 sm:$0xff] %v743_v35 }
  0xcd   : > { %v350_v47 = vld.sshfl [vmem:[#allocation1] sm:$0xff pattern:$0x75316420]  ;;  %307 = vrot.lane.b32.xlu0 %v301_v46, %s701_s3  ;;  %v351_v48 = vld.sshfl [vmem:[#allocation1 + $0x8] sm:$0xff pattern:$0x75316420] }
  0xce   : > { %373 = vst [vmem:[#allocation1 + $0x1] ss:$2 sm:$0xff] %v739_v28 }
  0xd3   : > { %v328_v49 = vld.sshfl [vmem:[#allocation1 + $0x18] sm:$0xff pattern:$0x75316420]  ;;  %v327_v50 = vld.sshfl [vmem:[#allocation1 + $0x10] sm:$0xff pattern:$0x75316420] }
  0xd4   : > { %356 = vrot.lane.b32.xlu1 %v351_v48, %s704_s6  ;;  %333 = vrot.lane.b32.xlu2 %v327_v50, %s703_s5  ;;  %349 = vst [vmem:[#allocation1 + $0x10] ss:$2 sm:$0xff] %v743_v35 }
  0xd5   : > { %v376_v51 = vld.sshfl [vmem:[#allocation1] sm:$0xff pattern:$0x75316420]  ;;  %v377_v52 = vld.sshfl [vmem:[#allocation1 + $0x8] sm:$0xff pattern:$0x75316420]  ;;  %335 = vrot.lane.b32.xlu0 %v328_v49, %s703_s5 }
  0xd6   : > { %398 = vst [vmem:[#allocation1] ss:$2 sm:$0xff] %v739_v28 }
  0xdb   : > { %v353_v53 = vld.sshfl [vmem:[#allocation1 + $0x18] sm:$0xff pattern:$0x75316420]  ;;  %v352_v54 = vld.sshfl [vmem:[#allocation1 + $0x10] sm:$0xff pattern:$0x75316420] }
  0xdc   : > { %358 = vrot.lane.b32.xlu2 %v352_v54, %s704_s6  ;;  %375 = vst [vmem:[#allocation1 + $0x11] ss:$2 sm:$0xff] %v743_v35 }
  0xdd   : > { %360 = vrot.lane.b32.xlu0 %v353_v53, %s704_s6  ;;  %v402_v55 = vld.sshfl [vmem:[#allocation1 + $0x8] sm:$0xff pattern:$0x75316420]  ;;  %v401_v56 = vld.sshfl [vmem:[#allocation1] sm:$0xff pattern:$0x75316420] }
  0xde   : > { %424 = vst [vmem:[#allocation1 + $0x1] ss:$2 sm:$0xff] %v739_v28 }
  0xe3   : > { %v378_v57 = vld.sshfl [vmem:[#allocation1 + $0x10] sm:$0xff pattern:$0x75316420]  ;;  %v379_v58 = vld.sshfl [vmem:[#allocation1 + $0x18] sm:$0xff pattern:$0x75316420] }
  0xe4   : > { %382 = vrot.lane.b32.xlu2 %v377_v52, %s705_s7  ;;  %384 = vrot.lane.b32.xlu1 %v378_v57, %s705_s7  ;;  %400 = vst [vmem:[#allocation1 + $0x10] ss:$2 sm:$0xff] %v743_v35 }
  0xe5   : > { %407 = vrot.lane.b32.xlu0 %v402_v55, %s706_s8  ;;  %v428_v59 = vld.sshfl [vmem:[#allocation1 + $0x8] sm:$0xff pattern:$0x75316420]  ;;  %v427_v60 = vld.sshfl [vmem:[#allocation1] sm:$0xff pattern:$0x75316420] }
  0xe6   : > { %449 = vst [vmem:[#allocation1] ss:$2 sm:$0xff] %v739_v28 }
  0xeb   : > { %v404_v61 = vld.sshfl [vmem:[#allocation1 + $0x18] sm:$0xff pattern:$0x75316420]  ;;  %v403_v62 = vld.sshfl [vmem:[#allocation1 + $0x10] sm:$0xff pattern:$0x75316420] }
  0xec   : > { %386 = vrot.lane.b32.xlu2 %v379_v58, %s705_s7  ;;  %411 = vrot.lane.b32.xlu1 %v404_v61, %s706_s8  ;;  %426 = vst [vmem:[#allocation1 + $0x11] ss:$2 sm:$0xff] %v743_v35 }
  0xed   : > { %405 = vrot.lane.b32.xlu0 %v401_v56, %s706_s8  ;;  %v452_v1 = vld.sshfl [vmem:[#allocation1] sm:$0xff pattern:$0x75316420]  ;;  %v453_v2 = vld.sshfl [vmem:[#allocation1 + $0x8] sm:$0xff pattern:$0x75316420] }
  0xf3   : > { %v429_v63 = vld.sshfl [vmem:[#allocation1 + $0x10] sm:$0xff pattern:$0x75316420]  ;;  %v430_v0 = vld.sshfl [vmem:[#allocation1 + $0x18] sm:$0xff pattern:$0x75316420] }
  0xf4   : > { %433 = vrot.lane.b32.xlu1 %v428_v59, %s707_s11  ;;  %435 = vrot.lane.b32.xlu2 %v429_v63, %s707_s11  ;;  %451 = vst [vmem:[#allocation1 + $0x10] ss:$2 sm:$0xff] %v743_v35 }
  0xf5   : > { %409 = vrot.lane.b32.xlu0 %v403_v62, %s706_s8 }
  0xfb   : > { %v455_v3 = vld.sshfl [vmem:[#allocation1 + $0x18] sm:$0xff pattern:$0x75316420]  ;;  %v454_v4 = vld.sshfl [vmem:[#allocation1 + $0x10] sm:$0xff pattern:$0x75316420] }
  0xfc   : > { %431 = vrot.lane.b32.xlu1 %v427_v60, %s707_s11  ;;  %456 = vrot.lane.b32.xlu2 %v452_v1, %s708_s12 }
  0xfd   : > { %437 = vrot.lane.b32.xlu0 %v430_v0, %s707_s11 }
 0x104   : > { %458 = vrot.lane.b32.xlu1 %v453_v2, %s708_s12  ;;  %462 = vrot.lane.b32.xlu2 %v455_v3, %s708_s12 }
 0x105   : > { %354 = vrot.lane.b32.xlu0 %v350_v47, %s704_s6 }
 0x10c   : > { %280 = vrot.lane.b32.xlu2 %v748_v37, %s702_s4  ;;  %460 = vrot.lane.b32.xlu1 %v454_v4, %s708_s12 }
 0x10d   : > { %303 = vrot.lane.b32.xlu0 %v752_v40, %s701_s3 }
 0x114   : > { %278 = vrot.lane.b32.xlu2 %v746_v36, %s702_s4  ;;  %380 = vrot.lane.b32.xlu1 %v376_v51, %s705_s7 }
 0x11c   : > { %329 = vrot.lane.b32.xlu1 %v759_v43, %s703_s5 }
 0x11e   : > { %v283_v5 = vpop.permute.xlu2 %282 }
 0x126   : > { %v793_v6 = vpop.permute.xlu2 %331 }
 0x12e   : > { %v334_v7 = vpop.permute.xlu2 %333 }
 0x12f   : > { %v339_v8 = vsel %vm337_vm13, %v793_v6, %v334_v7 }
 0x130   : > { %345 = vst [vmem:[#allocation3 + $0x50] sm:$0xf0] %v339_v8  ;;  %v797_v9 = vpop.permute.xlu1 %305 }
 0x136   : > { %v285_v10 = vpop.permute.xlu0 %284  ;;  %v359_v11 = vpop.permute.xlu2 %358 }
 0x137   : > { %v289_v12 = vsel %vm286_vm14, %v283_v5, %v285_v10  ;;  %v474_v10 = vld [vmem:[%s838_s1] sm:$0xf] }
 0x138   : > { %295 = vst [vmem:[#allocation3 + $0x58] sm:$0xf0] %v289_v12 }
 0x13e   : > { %v310_v13 = vpop.permute.xlu1 %309  ;;  %v800_v14 = vpop.permute.xlu2 %382 }
 0x13f   : > { %v308_v15 = vpop.permute.xlu0 %307 }
 0x140   : > { %v313_v16 = vsel %vm311_vm15, %v797_v9, %v308_v15  ;;  %v314_v17 = vsel %vm311_vm15, %v308_v15, %v310_v13 }
 0x141   : > { %319 = vst [vmem:[#allocation3 + $0x50] sm:$0xf] %v313_v16 }
 0x142   : > { %320 = vst [vmem:[#allocation3 + $0x68] sm:$0xf] %v314_v17 }
 0x146   : > { %v357_v18 = vpop.permute.xlu1 %356  ;;  %v387_v19 = vpop.permute.xlu2 %386 }
 0x147   : > { %v364_v20 = vsel %vm362_vm1, %v357_v18, %v359_v11  ;;  %v336_v21 = vpop.permute.xlu0 %335 }
 0x148   : > { %370 = vst [vmem:[#allocation3 + $0x48] sm:$0xf] %v364_v20  ;;  %v340_v22 = vsel %vm337_vm13, %v334_v7, %v336_v21  ;;  %v479_v3 = vld [vmem:[#allocation3 + $0x50] sm:$0xff] }
 0x149   : > { %346 = vst [vmem:[#allocation3 + $0x68] sm:$0xf0] %v340_v22 }
 0x14e   : > { %v436_v23 = vpop.permute.xlu2 %435 }
 0x14f   : > { %v361_v24 = vpop.permute.xlu0 %360 }
 0x150   : > { %v365_v25 = vsel %vm362_vm1, %v359_v11, %v361_v24  ;;  %v477_v11 = vld [vmem:[#allocation3 + $0x58] sm:$0xff] }
 0x151   : > { %371 = vst [vmem:[#allocation3 + $0x40] sm:$0xf] %v365_v25 }
 0x156   : > { %v385_v26 = vpop.permute.xlu1 %384  ;;  %v457_v27 = vpop.permute.xlu2 %456 }
 0x157   : > { %v408_v28 = vpop.permute.xlu0 %407  ;;  %v390_v29 = vsel %vm388_vm2, %v800_v14, %v385_v26  ;;  %v391_v30 = vsel %vm388_vm2, %v385_v26, %v387_v19 }
 0x158   : > { %396 = vst [vmem:[#allocation3 + $0x48] sm:$0xf0] %v390_v29 }
 0x159   : > { %397 = vst [vmem:[#allocation3 + $0x40] sm:$0xf0] %v391_v30 }
 0x15e   : > { %v412_v31 = vpop.permute.xlu1 %411  ;;  %v463_v32 = vpop.permute.xlu2 %462 }
 0x15f   : > { %v406_v33 = vpop.permute.xlu0 %405  ;;  %v482_v1 = vld [vmem:[#allocation3 + $0x48] sm:$0xff] }
 0x160   : > { %v414_v34 = vsel %vm413_vm3, %v406_v33, %v408_v28  ;;  %v483_v2 = vld [vmem:[#allocation3 + $0x40] sm:$0xff] }
 0x161   : > { %420 = vst [vmem:[#allocation3 + $0x20] sm:$0xf] %v414_v34 }
 0x166   : > { %v434_v35 = vpop.permute.xlu1 %433  ;;  %v281_v36 = vpop.permute.xlu2 %280 }
 0x167   : > { %v441_v37 = vsel %vm439_vm4, %v434_v35, %v436_v23  ;;  %v410_v38 = vpop.permute.xlu0 %409  ;;  %v288_v41 = vsel %vm286_vm14, %v281_v36, %v283_v5  ;;  %v480_v5 = vld [vmem:[#allocation3 + $0x68] sm:$0xff] }
 0x168   : > { %447 = vst [vmem:[#allocation3 + $0x10] sm:$0xf0] %v441_v37  ;;  %v415_v39 = vsel %vm413_vm3, %v408_v28, %v410_v38  ;;  %v416_v40 = vsel %vm413_vm3, %v410_v38, %v412_v31 }
 0x169   : > { %421 = vst [vmem:[#allocation3 + $0x10] sm:$0xf] %v415_v39 }
 0x16a   : > { %422 = vst [vmem:[#allocation3 + $0x38] sm:$0xf] %v416_v40 }
 0x16b   : > { %294 = vst [vmem:[#allocation3] sm:$0xf0] %v288_v41 }
 0x16e   : > { %v432_v42 = vpop.permute.xlu1 %431  ;;  %v279_v43 = vpop.permute.xlu2 %278 }
 0x16f   : > { %v440_v44 = vsel %vm439_vm4, %v432_v42, %v434_v35  ;;  %v438_v45 = vpop.permute.xlu0 %437  ;;  %v287_v46 = vsel %vm286_vm14, %v279_v43, %v281_v36 }
 0x170   : > { %446 = vst [vmem:[#allocation3 + $0x20] sm:$0xf0] %v440_v44  ;;  %v442_v47 = vsel %vm439_vm4, %v436_v23, %v438_v45  ;;  %v485_v63 = vld [vmem:[#allocation3 + $0x10] sm:$0xff] }
 0x171   : > { %448 = vst [vmem:[#allocation3 + $0x38] sm:$0xf0] %v442_v47 }
 0x172   : > { %293 = vst [vmem:[#allocation3 + $0x30] sm:$0xf0] %v287_v46 }
 0x176   : > { %v459_v48 = vpop.permute.xlu1 %458 }
 0x177   : > { %v465_v49 = vsel %vm464_vm5, %v457_v27, %v459_v48  ;;  %v355_v50 = vpop.permute.xlu0 %354  ;;  %v484_v58 = vld [vmem:[#allocation3 + $0x20] sm:$0xff] }
 0x178   : > { %471 = vst [vmem:[#allocation3 + $0x60] sm:$0xf] %v465_v49  ;;  %v363_v51 = vsel %vm362_vm1, %v355_v50, %v357_v18  ;;  %v486_v0 = vld [vmem:[#allocation3 + $0x38] sm:$0xff] }
 0x179   : > { %369 = vst [vmem:[#allocation3 + $0x8] sm:$0xf] %v363_v51  ;;  %v475_v13 = vld [vmem:[#allocation3 + $0x30] sm:$0xff] }
 0x17e   : > { %v461_v52 = vpop.permute.xlu1 %460 }
 0x17f   : > { %v304_v53 = vpop.permute.xlu0 %303  ;;  %v466_v54 = vsel %vm464_vm5, %v459_v48, %v461_v52  ;;  %v467_v55 = vsel %vm464_vm5, %v461_v52, %v463_v32  ;;  %v487_v56 = vld [vmem:[#allocation3 + $0x60] sm:$0xf] }
 0x180   : > { %v312_v57 = vsel %vm311_vm15, %v304_v53, %v797_v9  ;;  %472 = vst [vmem:[#allocation3 + $0x70] sm:$0xf] %v466_v54  ;;  %633 = vmatpush.msk.msra.mxu0 %vm145_vm0, %v487_v56  ;;  %v476_v9 = vld [vmem:[#allocation3] sm:$0xff] }
 0x181   : > { %318 = vst [vmem:[#allocation3 + $0x18] sm:$0xf] %v312_v57 }
 0x182   : > { %473 = vst [vmem:[#allocation3 + $0x28] sm:$0xf] %v467_v55  ;;  %515 = vmatpush.msra.mxu0 %v484_v58 }
 0x186   : > { %v381_v59 = vpop.permute.xlu1 %380 }
 0x187   : > { %v389_v60 = vsel %vm388_vm2, %v381_v59, %v800_v14  ;;  %v488_v61 = vld [vmem:[#allocation3 + $0x70] sm:$0xf] }
 0x188   : > { %395 = vst [vmem:[#allocation3 + $0x8] sm:$0xf0] %v389_v60  ;;  %635 = vmatpush.msk.msra.mxu1 %vm145_vm0, %v488_v61 }
 0x189   : > { %v489_v62 = vld [vmem:[#allocation3 + $0x28] sm:$0xf] }
 0x18a   : > { %637 = vmatpush.msk.msra.mxu2 %vm145_vm0, %v489_v62  ;;  %535 = vmatpush.msra.mxu1 %v485_v63 }
 0x18c   : > { %555 = vmatpush.msra.mxu2 %v486_v0  ;;  %536 = vmatpush.msra.mxu1 %v482_v1 }
 0x18e   : > { %556 = vmatpush.msra.mxu2 %v483_v2  ;;  %537 = vmatpush.msra.mxu1 %v479_v3  ;;  %v330_v4 = vpop.permute.xlu1 %329 }
 0x18f   : > { %v338_v7 = vsel %vm337_vm13, %v330_v4, %v793_v6  ;;  %v481_v8 = vld [vmem:[#allocation3 + $0x8] sm:$0xff] }
 0x190   : > { %557 = vmatpush.msra.mxu2 %v480_v5  ;;  %344 = vst [vmem:[#allocation3 + $0x18] sm:$0xf0] %v338_v7  ;;  %516 = vmatpush.msra.mxu0 %v481_v8 }
 0x191   : > { %538 = vmatpush.msra.mxu1 %v476_v9 }
 0x192   : > { %558 = vmatpush.msra.mxu2 %v477_v11  ;;  %636 = vmatmul.msk.f32.vlgmr.msra.gmra.mxu1 %vm490_vm6, %v474_v10 }
 0x193   : > { %638 = vmatmul.msk.f32.vlgmr.msra.gmra.mxu2 %vm490_vm6, %v474_v10 }
 0x197   : > { %v478_v12 = vld [vmem:[#allocation3 + $0x18] sm:$0xff] }
 0x198   : > { %517 = vmatpush.msra.mxu0 %v478_v12 }
 0x19a   : > { %518 = vmatpush.msra.mxu0 %v475_v13 }
 0x19b   : > { %634 = vmatmul.msk.f32.vlgmr.msra.gmra.mxu0 %vm490_vm6, %v474_v10 }
 0x20f   : > { %v540_v6 = vpop.f32.mrf.mxu1 }
 0x210   : > { %v565_v14 = vrot.slane %v540_v6, 4 }
 0x216   : > { %v560_v15 = vpop.f32.mrf.mxu2 }
 0x217   : > { %569 = vst [vmem:[%s143_s18 + $0x8] sm:$0xf] %v560_v15 }
 0x218   : > { %v520_v16 = vpop.f32.mrf.mxu0 }
 0x219   : > { %v566_v17 = vsel %vm145_vm0, %v520_v16, %v565_v14 }
 0x21a   : > { %568 = vst [vmem:[%s143_s18] sm:$0xff] %v566_v17 }
 0x21b PF: > { %s12_s9 = sadd.s32 1, %s682_s9  }
 0x21c   : > { %p9_p4 = scmp.ge.s32.totalorder %s12_s9, 4  }
 0x21e   :  { %11 = sbr.rel (!%p9_p4) target bundleno = 1 (0x1), region = 71 }

</bundles_post_ra>
